<compile_context>
chip_gen: v7x
topology: tpu7x:2x2x1
jax: 0.10.0
libtpu: 0.0.40
codegen_flags: <defaults>
</compile_context>

<pallas_src>
import jax
import jax.numpy as jnp
from jax import lax
from jax.experimental import pallas as pl
from jax.experimental.pallas import tpu as pltpu


def _round_up(x, m):
    return (x + m - 1) // m * m


def _make_kernel(l_tile, l_real, l_pad):
    """Builds the fused bottleneck kernel. `l_real` is the true sequence length,
    `l_pad` the wrapper-padded length; both are trace-time constants."""
    has_pad = l_pad != l_real

    def kernel(x_ref, xl_ref, xr_ref,
               w1_ref, b1_ref, w2p_ref, w2c_ref, w2n_ref, b2_ref,
               w3_ref, b3_ref, o_ref):
        B, TL, Cp = x_ref.shape
        Pp = w1_ref.shape[1]
        l = pl.program_id(1)

        x = x_ref[...]                                     # (B, TL, Cp) bf16
        x2d = x.reshape(B * TL, Cp)

        # ---- conv1 (1x1, BN1 folded into w1) + bias + ReLU ----
        h = jnp.dot(x2d, w1_ref[...], preferred_element_type=jnp.float32)
        h = jnp.maximum(h + b1_ref[...], 0.0)              # (B*TL, Pp) f32

        # ---- conv2 halo rows (row just before / after this L tile), both in a
        # single skinny matmul. At true sequence edges (and where the neighbour
        # row lies in the padded-L region) the halo is conv2's zero padding
        # (exactly 0), not conv1 applied to a zero row.
        xh = jnp.concatenate([xl_ref[...].reshape(B, Cp),
                              xr_ref[...].reshape(B, Cp)], axis=0)   # (2B, Cp)
        hh = jnp.dot(xh, w1_ref[...], preferred_element_type=jnp.float32)
        hh = jnp.maximum(hh + b1_ref[...], 0.0)
        hl = jnp.where(l == 0, 0.0, hh[:B])                          # (B, Pp) f32
        hr = jnp.where((l + 1) * TL >= l_real, 0.0, hh[B:])          # (B, Pp) f32

        # ---- conv2 (k=3, pad=1, BN2 folded): three accumulated MXU dots over
        # h[t-1], h[t], h[t+1]. Shifts along L use the XLU roll; boundary rows
        # are replaced by the halo rows via a small (1, TL, 1) row-index mask.
        hc_f = h.reshape(B, TL, Pp)
        ridx = lax.broadcasted_iota(jnp.int32, (1, TL, 1), 1)
        if has_pad:
            # Zero h on padded-L rows so they cannot leak into the last real
            # row through the t+1 tap (conv1 of a zero x row is relu(b1) != 0).
            hc_f = jnp.where(l * TL + ridx < l_real, hc_f, 0.0)
        h_prev = jnp.where(ridx == 0, hl[:, None, :],
                           pltpu.roll(hc_f, shift=1, axis=1)).astype(jnp.bfloat16)
        h_next = jnp.where(ridx == TL - 1, hr[:, None, :],
                           pltpu.roll(hc_f, shift=TL - 1, axis=1)).astype(jnp.bfloat16)
        hc = hc_f.astype(jnp.bfloat16)

        h2 = jnp.dot(h_prev.reshape(B * TL, Pp), w2p_ref[...],
                     preferred_element_type=jnp.float32)
        h2 = h2 + jnp.dot(hc.reshape(B * TL, Pp), w2c_ref[...],
                          preferred_element_type=jnp.float32)
        h2 = h2 + jnp.dot(h_next.reshape(B * TL, Pp), w2n_ref[...],
                          preferred_element_type=jnp.float32)
        h2 = jnp.maximum(h2 + b2_ref[...], 0.0)            # (B*TL, Pp) f32

        # ---- conv3 (1x1, BN3 folded) + bias + identity (f32 add) + ReLU ----
        y = jnp.dot(h2.astype(jnp.bfloat16), w3_ref[...],
                    preferred_element_type=jnp.float32)
        y = jnp.maximum(y + b3_ref[...] + x2d.astype(jnp.float32), 0.0)
        o_ref[...] = y.reshape(B, TL, Cp).astype(o_ref.dtype)

    return kernel


def bottleneck1d_forward(x_nlc, xl, xr, w1, b1, w2p, w2c, w2n, b2, w3, b3, *,
                         b_tile, l_tile, l_real, vmem_limit_bytes):
    """x_nlc: (N, L_pad, Cp) bf16, channel/L-padded. Halos xl/xr: (N, nl, Cp) bf16.
    Weights BN-scaled, padded, bf16; biases f32 (1, C)."""
    N, L_pad, Cp = x_nlc.shape
    Pp = w1.shape[1]
    nb, nl = N // b_tile, L_pad // l_tile

    wmap = lambda b, l: (0, 0)
    xmap = lambda b, l: (b, l, 0)
    grid_spec = pltpu.PrefetchScalarGridSpec(
        num_scalar_prefetch=0,
        grid=(nb, nl),
        in_specs=[
            pl.BlockSpec((b_tile, l_tile, Cp), xmap),   # x (bf16)
            pl.BlockSpec((b_tile, 1, Cp), xmap),        # left halo row (bf16)
            pl.BlockSpec((b_tile, 1, Cp), xmap),        # right halo row (bf16)
            pl.BlockSpec((Cp, Pp), wmap),               # w1 (bf16, BN1-scaled)
            pl.BlockSpec((1, Pp), wmap),                # b1 (f32)
            pl.BlockSpec((Pp, Pp), wmap),               # w2 tap for h[t-1]
            pl.BlockSpec((Pp, Pp), wmap),               # w2 tap for h[t]
            pl.BlockSpec((Pp, Pp), wmap),               # w2 tap for h[t+1]
            pl.BlockSpec((1, Pp), wmap),                # b2 (f32)
            pl.BlockSpec((Pp, Cp), wmap),               # w3 (bf16, BN3-scaled)
            pl.BlockSpec((1, Cp), wmap),                # b3 (f32)
        ],
        out_specs=pl.BlockSpec((b_tile, l_tile, Cp), xmap),
    )
    # TODO(synk): single-buffer the constant weight/bias blocks
    # (pipeline_mode=pl.Buffered(1)); the VMEM budget below conservatively
    # accounts for them double-buffered instead.
    return pl.pallas_call(
        _make_kernel(l_tile, l_real, L_pad),
        out_shape=jax.ShapeDtypeStruct((N, L_pad, Cp), jnp.bfloat16),
        grid_spec=grid_spec,
        compiler_params=pltpu.CompilerParams(
            dimension_semantics=("parallel", "parallel"),
            vmem_limit_bytes=int(vmem_limit_bytes)),
    )(x_nlc, xl, xr, w1, b1, w2p, w2c, w2n, b2, w3, b3)


def _vmem_limit_bytes():
    """VMEM budget the kernel may use: ~3/4 of per-core VMEM, capped at 64 MiB
    (v7x with 64 MiB/TC -> ~48 MiB; v5e/v6e with 128 MiB -> 64 MiB)."""
    cap = 128 << 20
    try:
        cap = int(getattr(pltpu.get_tpu_info(), "vmem_capacity_bytes", cap))
    except Exception:
        pass
    return min(cap * 3 // 4, 64 << 20)


def _pick_tiles(N, L, Cp, Pp, vmem_limit, b_tile=None, l_tile=None):
    """Pick (b_tile, l_tile) from a VMEM byte budget.

    Per (batch*seq) row live bytes: x/out bf16 blocks double-buffered (4*Cp each),
    f32 x-upcast + f32 y (8*Cp), f32 h/h2/rolled temps + bf16 taps (~18*Pp)."""
    per_row = 16 * Cp + 18 * Pp
    # weights (bf16) + biases (f32), double-buffered by the pipeline
    w_bytes = 4 * (Cp * Pp + 3 * Pp * Pp + Pp * Cp) + 8 * (2 * Pp + Cp)
    budget = int(vmem_limit * 0.7) - w_bytes - (2 << 20)          # slack
    max_rows = min(max(8, budget // per_row), 8192)

    if l_tile is None:
        l_tile = min(L, 512, max_rows)
        if l_tile < L:
            l_tile = max(8, (l_tile // 8) * 8)
    if b_tile is None:
        b_tile = int(max(1, min(N, max_rows // max(l_tile, 1))))
        while N % b_tile:
            b_tile -= 1
        nl = -(-L // l_tile)
        if (N // b_tile) * nl < 2 and N >= 2:
            # Keep >= 2 grid steps so both TensorCores (megacore / v7x) get work.
            b_tile = N // 2
            while N % b_tile:
                b_tile -= 1
    return b_tile, l_tile


def fold_bn(gamma, beta, mean, var, eps=1e-5):
    scale = gamma / jnp.sqrt(var + eps)
    bias = beta - mean * scale
    return scale.astype(jnp.float32), bias.astype(jnp.float32)


def bottleneck1d_apply(x_ncl, w1_t, w2_t, w3_t, bn1, bn2, bn3,
                       eps=1e-5, b_tile=None, l_tile=None):
    """Full Bottleneck1D forward (eval-mode BN, stride=1, no downsample).

    x_ncl: (N, Cin, L) f32 in PyTorch layout. w*_t: PyTorch Conv1d weights
    (out_ch, in_ch, k). bn*: (gamma, beta, running_mean, running_var)."""
    N, Cin, L = x_ncl.shape
    P = w1_t.shape[0]
    Cout = w3_t.shape[0]
    assert Cout == Cin, "identity path requires in_channels == planes * expansion"

    s1, c1 = fold_bn(*bn1, eps)
    s2, c2 = fold_bn(*bn2, eps)
    s3, c3 = fold_bn(*bn3, eps)

    # Lane padding to 128 only (do not over-pad small channel counts).
    Cp = _round_up(Cin, 128)
    Pp = _round_up(P, 128)

    vmem_limit = _vmem_limit_bytes()
    b_tile, l_tile = _pick_tiles(N, L, Cp, Pp, vmem_limit, b_tile, l_tile)
    nl = -(-L // l_tile)
    L_pad = nl * l_tile

    # NLC layout, channels zero-padded to the lane width, L padded to a multiple
    # of l_tile, activations in bf16 (HBM-bound regime -> halve the I/O bytes).
    x_nlc = jnp.transpose(x_ncl, (0, 2, 1))
    x_nlc = jnp.pad(x_nlc, ((0, 0), (0, L_pad - L), (0, Cp - Cin)))
    x_nlc = x_nlc.astype(jnp.bfloat16)

    # Fold BN scales into the conv weights, pad, cast to bf16 for the MXU.
    w1 = jnp.transpose(w1_t[:, :, 0], (1, 0)) * s1[None, :]        # (Cin, P)
    w1 = jnp.pad(w1, ((0, Cp - Cin), (0, Pp - P))).astype(jnp.bfloat16)

    def w2_tap(k):
        w = jnp.transpose(w2_t[:, :, k], (1, 0)) * s2[None, :]     # (P, P)
        return jnp.pad(w, ((0, Pp - P), (0, Pp - P))).astype(jnp.bfloat16)
    w2p, w2c, w2n = w2_tap(0), w2_tap(1), w2_tap(2)                # taps t-1, t, t+1

    w3 = jnp.transpose(w3_t[:, :, 0], (1, 0)) * s3[None, :]        # (P, Cout)
    w3 = jnp.pad(w3, ((0, Pp - P), (0, Cp - Cout))).astype(jnp.bfloat16)

    b1 = jnp.pad(c1, (0, Pp - P))[None, :].astype(jnp.float32)
    b2 = jnp.pad(c2, (0, Pp - P))[None, :].astype(jnp.float32)
    b3 = jnp.pad(c3, (0, Cp - Cout))[None, :].astype(jnp.float32)

    # conv2 halo rows per L tile (row just before / after each tile). Zeros at
    # the ends are placeholders; the kernel zeroes edge / padded halos itself.
    zeros = jnp.zeros((N, 1, Cp), x_nlc.dtype)
    if nl > 1:
        xl = jnp.concatenate(
            [zeros, x_nlc[:, l_tile - 1::l_tile, :][:, :nl - 1, :]], axis=1)
        xr = jnp.concatenate([x_nlc[:, l_tile::l_tile, :], zeros], axis=1)
    else:
        xl, xr = zeros, zeros

    out = bottleneck1d_forward(x_nlc, xl, xr, w1, b1, w2p, w2c, w2n, b2, w3, b3,
                               b_tile=b_tile, l_tile=l_tile, l_real=L,
                               vmem_limit_bytes=vmem_limit)
    out = out[:, :L, :Cout]
    return jnp.transpose(out, (0, 2, 1)).astype(jnp.float32)   # back to NCL


def ref_forward_ncl(x_ncl, w1_t, w2_t, w3_t, bns):
    """Pure-JAX f32 reference on NCL layout (mirrors the PyTorch module, eval BN)."""
    dn = ('NCH', 'OIH', 'NCH')
    (s1, b1), (s2, b2), (s3, b3) = bns

    def bn(o, s, b):
        return o * s[None, :, None] + b[None, :, None]

    out = lax.conv_general_dilated(x_ncl, w1_t, (1,), 'VALID', dimension_numbers=dn)
    out = jnp.maximum(bn(out, s1, b1), 0.0)
    out = lax.conv_general_dilated(out, w2_t, (1,), ((1, 1),), dimension_numbers=dn)
    out = jnp.maximum(bn(out, s2, b2), 0.0)
    out = lax.conv_general_dilated(out, w3_t, (1,), 'VALID', dimension_numbers=dn)
    out = bn(out, s3, b3)
    return jnp.maximum(out + x_ncl, 0.0)


if __name__ == "__main__":
    # Small shapes: in_channels = planes * expansion so the identity path is valid
    # (how Bottleneck1D is used without a downsample layer).
    N, L = 2, 16
    planes = 4
    expansion = 4
    Cin = planes * expansion      # 16
    Cout = planes * expansion     # 16

    key = jax.random.PRNGKey(0)
    ks = jax.random.split(key, 8)

    # PyTorch Conv1d weight layout: (out_channels, in_channels, kernel_size)
    w1_t = 0.1 * jax.random.normal(ks[0], (planes, Cin, 1), jnp.float32)
    w2_t = 0.1 * jax.random.normal(ks[1], (planes, planes, 3), jnp.float32)
    w3_t = 0.1 * jax.random.normal(ks[2], (Cout, planes, 1), jnp.float32)

    def bn_params(k, c):
        k1, k2, k3, k4 = jax.random.split(k, 4)
        gamma = 0.5 + jax.random.uniform(k1, (c,), jnp.float32)
        beta = 0.1 * jax.random.normal(k2, (c,), jnp.float32)
        mean = 0.1 * jax.random.normal(k3, (c,), jnp.float32)
        var = 0.5 + jax.random.uniform(k4, (c,), jnp.float32)
        return gamma, beta, mean, var

    bn1 = bn_params(ks[3], planes)
    bn2 = bn_params(ks[4], planes)
    bn3 = bn_params(ks[5], Cout)

    # Input in PyTorch NCL layout.
    x_ncl = jax.random.normal(ks[6], (N, Cin, L), jnp.float32)
    bns = (fold_bn(*bn1), fold_bn(*bn2), fold_bn(*bn3))

    # Exercise: (1) default budget-picked tiles, (2) L tiling with halos,
    # (3) non-divisible L -> padded-L + halo path.
    configs = [
        ("default", x_ncl, None, None),
        ("l_tiled_halos", x_ncl, None, 8),
        ("padded_L", x_ncl[:, :, :12], None, 8),
    ]
    for name, x_in, bt, lt in configs:
        out = bottleneck1d_apply(x_in, w1_t, w2_t, w3_t, bn1, bn2, bn3,
                                 b_tile=bt, l_tile=lt)
        out = jax.block_until_ready(out)
        ref = ref_forward_ncl(x_in, w1_t, w2_t, w3_t, bns)
        err = float(jnp.max(jnp.abs(out - ref)))
        # bf16 activation I/O + bf16 MXU inputs end-to-end -> loose-ish tolerance.
        assert err < 1e-1, f"{name}: max abs err {err}"

    print("KERNEL_OK")
</pallas_src>

<mosaic_0001>
module attributes {stable_mosaic.version = 11 : i64} {
  func.func @kernel(%arg0: i32, %arg1: i32, %arg2: memref<1x16x128xbf16, #tpu.memory_space<vmem>>, %arg3: memref<1x1x128xbf16, #tpu.memory_space<vmem>>, %arg4: memref<1x1x128xbf16, #tpu.memory_space<vmem>>, %arg5: memref<128x128xbf16, #tpu.memory_space<vmem>>, %arg6: memref<1x128xf32, #tpu.memory_space<vmem>>, %arg7: memref<128x128xbf16, #tpu.memory_space<vmem>>, %arg8: memref<128x128xbf16, #tpu.memory_space<vmem>>, %arg9: memref<128x128xbf16, #tpu.memory_space<vmem>>, %arg10: memref<1x128xf32, #tpu.memory_space<vmem>>, %arg11: memref<128x128xbf16, #tpu.memory_space<vmem>>, %arg12: memref<1x128xf32, #tpu.memory_space<vmem>>, %arg13: memref<1x16x128xbf16, #tpu.memory_space<vmem>>) attributes {dimension_semantics = [#tpu.dimension_semantics<parallel>, #tpu.dimension_semantics<parallel>], iteration_bounds = array<i64: 2, 1>, scalar_prefetch = 0 : i64, scratch_operands = 0 : i64, tpu.core_type = #tpu.core_type<tc>, window_params = [{transform_indices = @transform_0, window_bounds = array<i64: 1, 16, 128>}, {transform_indices = @transform_1, window_bounds = array<i64: 1, 1, 128>}, {transform_indices = @transform_2, window_bounds = array<i64: 1, 1, 128>}, {pipeline_mode = #tpu.pipeline_mode<synchronous>, transform_indices = @transform_3, window_bounds = array<i64: 128, 128>}, {pipeline_mode = #tpu.pipeline_mode<synchronous>, transform_indices = @transform_4, window_bounds = array<i64: 1, 128>}, {pipeline_mode = #tpu.pipeline_mode<synchronous>, transform_indices = @transform_5, window_bounds = array<i64: 128, 128>}, {pipeline_mode = #tpu.pipeline_mode<synchronous>, transform_indices = @transform_6, window_bounds = array<i64: 128, 128>}, {pipeline_mode = #tpu.pipeline_mode<synchronous>, transform_indices = @transform_7, window_bounds = array<i64: 128, 128>}, {pipeline_mode = #tpu.pipeline_mode<synchronous>, transform_indices = @transform_8, window_bounds = array<i64: 1, 128>}, {pipeline_mode = #tpu.pipeline_mode<synchronous>, transform_indices = @transform_9, window_bounds = array<i64: 128, 128>}, {pipeline_mode = #tpu.pipeline_mode<synchronous>, transform_indices = @transform_10, window_bounds = array<i64: 1, 128>}, {transform_indices = @transform_11, window_bounds = array<i64: 1, 16, 128>}]} {
    %c0 = arith.constant 0 : index
    %c0_0 = arith.constant 0 : index
    %c0_1 = arith.constant 0 : index
    %0 = vector.load %arg2[%c0, %c0_0, %c0_1] : memref<1x16x128xbf16, #tpu.memory_space<vmem>>, vector<1x16x128xbf16>
    %1 = vector.shape_cast %0 : vector<1x16x128xbf16> to vector<16x128xbf16>
    %c0_2 = arith.constant 0 : index
    %c0_3 = arith.constant 0 : index
    %2 = vector.load %arg5[%c0_2, %c0_3] : memref<128x128xbf16, #tpu.memory_space<vmem>>, vector<128x128xbf16>
    %cst = arith.constant dense<0.000000e+00> : vector<16x128xf32>
    %3 = tpu.matmul %1, %2, %cst {dimension_numbers = #tpu.dot_dimension_numbers<[1], [0], [0], [1], [0, 0, 1, 1], [], []>} : vector<16x128xbf16>, vector<128x128xbf16>, vector<16x128xf32> -> vector<16x128xf32>
    %c0_4 = arith.constant 0 : index
    %c0_5 = arith.constant 0 : index
    %4 = vector.load %arg6[%c0_4, %c0_5] : memref<1x128xf32, #tpu.memory_space<vmem>>, vector<1x128xf32>
    %5 = vector.broadcast %4 : vector<1x128xf32> to vector<16x128xf32>
    %6 = arith.addf %3, %5 : vector<16x128xf32>
    %cst_6 = arith.constant 0.000000e+00 : f32
    %7 = vector.broadcast %cst_6 : f32 to vector<16x128xf32>
    %8 = arith.maximumf %6, %7 : vector<16x128xf32>
    %c0_7 = arith.constant 0 : index
    %c0_8 = arith.constant 0 : index
    %c0_9 = arith.constant 0 : index
    %9 = vector.load %arg3[%c0_7, %c0_8, %c0_9] : memref<1x1x128xbf16, #tpu.memory_space<vmem>>, vector<1x1x128xbf16>
    %10 = vector.shape_cast %9 : vector<1x1x128xbf16> to vector<1x128xbf16>
    %c0_10 = arith.constant 0 : index
    %c0_11 = arith.constant 0 : index
    %c0_12 = arith.constant 0 : index
    %11 = vector.load %arg4[%c0_10, %c0_11, %c0_12] : memref<1x1x128xbf16, #tpu.memory_space<vmem>>, vector<1x1x128xbf16>
    %12 = vector.shape_cast %11 : vector<1x1x128xbf16> to vector<1x128xbf16>
    %13 = tpu.concatenate %10, %12 in 0 : vector<1x128xbf16>, vector<1x128xbf16> -> vector<2x128xbf16>
    %c0_13 = arith.constant 0 : index
    %c0_14 = arith.constant 0 : index
    %14 = vector.load %arg5[%c0_13, %c0_14] : memref<128x128xbf16, #tpu.memory_space<vmem>>, vector<128x128xbf16>
    %cst_15 = arith.constant dense<0.000000e+00> : vector<2x128xf32>
    %15 = tpu.matmul %13, %14, %cst_15 {dimension_numbers = #tpu.dot_dimension_numbers<[1], [0], [0], [1], [0, 0, 1, 1], [], []>} : vector<2x128xbf16>, vector<128x128xbf16>, vector<2x128xf32> -> vector<2x128xf32>
    %c0_16 = arith.constant 0 : index
    %c0_17 = arith.constant 0 : index
    %16 = vector.load %arg6[%c0_16, %c0_17] : memref<1x128xf32, #tpu.memory_space<vmem>>, vector<1x128xf32>
    %17 = vector.broadcast %16 : vector<1x128xf32> to vector<2x128xf32>
    %18 = arith.addf %15, %17 : vector<2x128xf32>
    %cst_18 = arith.constant 0.000000e+00 : f32
    %19 = vector.broadcast %cst_18 : f32 to vector<2x128xf32>
    %20 = arith.maximumf %18, %19 : vector<2x128xf32>
    %c0_i32 = arith.constant 0 : i32
    %21 = arith.cmpi eq, %arg1, %c0_i32 : i32
    %22 = vector.extract_strided_slice %20 {offsets = [0, 0], sizes = [1, 128], strides = [1, 1]} : vector<2x128xf32> to vector<1x128xf32>
    %cst_19 = arith.constant 0.000000e+00 : f32
    %23 = vector.broadcast %cst_19 : f32 to vector<1x128xf32>
    %24 = arith.select %21, %23, %22 : vector<1x128xf32>
    %c1_i32 = arith.constant 1 : i32
    %25 = arith.addi %arg1, %c1_i32 : i32
    %c16_i32 = arith.constant 16 : i32
    %26 = arith.muli %25, %c16_i32 : i32
    %c16_i32_20 = arith.constant 16 : i32
    %27 = arith.cmpi sge, %26, %c16_i32_20 : i32
    %28 = vector.extract_strided_slice %20 {offsets = [1, 0], sizes = [1, 128], strides = [1, 1]} : vector<2x128xf32> to vector<1x128xf32>
    %cst_21 = arith.constant 0.000000e+00 : f32
    %29 = vector.broadcast %cst_21 : f32 to vector<1x128xf32>
    %30 = arith.select %27, %29, %28 : vector<1x128xf32>
    %31 = vector.shape_cast %8 : vector<16x128xf32> to vector<1x16x128xf32>
    %32 = tpu.iota {dimensions = array<i32: 1>} : vector<1x16x1xi32>
    %c0_i32_22 = arith.constant 0 : i32
    %33 = vector.broadcast %c0_i32_22 : i32 to vector<1x16x1xi32>
    %34 = arith.cmpi eq, %32, %33 : vector<1x16x1xi32>
    %35 = vector.shape_cast %24 : vector<1x128xf32> to vector<1x1x128xf32>
    %c1_i32_23 = arith.constant 1 : i32
    %36 = tpu.dynamic_rotate %31 by %c1_i32_23 dim 1 : vector<1x16x128xf32>, i32 -> vector<1x16x128xf32>
    %37 = vector.shape_cast %34 : vector<1x16x1xi1> to vector<1x16x1xi1>
    %38 = vector.broadcast %37 : vector<1x16x1xi1> to vector<1x16x128xi1>
    %39 = vector.shape_cast %35 : vector<1x1x128xf32> to vector<1x1x128xf32>
    %40 = vector.broadcast %39 : vector<1x1x128xf32> to vector<1x16x128xf32>
    %41 = arith.select %38, %40, %36 : vector<1x16x128xi1>, vector<1x16x128xf32>
    %42 = arith.truncf %41 : vector<1x16x128xf32> to vector<1x16x128xbf16>
    %c15_i32 = arith.constant 15 : i32
    %43 = vector.broadcast %c15_i32 : i32 to vector<1x16x1xi32>
    %44 = arith.cmpi eq, %32, %43 : vector<1x16x1xi32>
    %45 = vector.shape_cast %30 : vector<1x128xf32> to vector<1x1x128xf32>
    %c15_i32_24 = arith.constant 15 : i32
    %46 = tpu.dynamic_rotate %31 by %c15_i32_24 dim 1 : vector<1x16x128xf32>, i32 -> vector<1x16x128xf32>
    %47 = vector.shape_cast %44 : vector<1x16x1xi1> to vector<1x16x1xi1>
    %48 = vector.broadcast %47 : vector<1x16x1xi1> to vector<1x16x128xi1>
    %49 = vector.shape_cast %45 : vector<1x1x128xf32> to vector<1x1x128xf32>
    %50 = vector.broadcast %49 : vector<1x1x128xf32> to vector<1x16x128xf32>
    %51 = arith.select %48, %50, %46 : vector<1x16x128xi1>, vector<1x16x128xf32>
    %52 = arith.truncf %51 : vector<1x16x128xf32> to vector<1x16x128xbf16>
    %53 = arith.truncf %31 : vector<1x16x128xf32> to vector<1x16x128xbf16>
    %54 = vector.shape_cast %42 : vector<1x16x128xbf16> to vector<16x128xbf16>
    %c0_25 = arith.constant 0 : index
    %c0_26 = arith.constant 0 : index
    %55 = vector.load %arg7[%c0_25, %c0_26] : memref<128x128xbf16, #tpu.memory_space<vmem>>, vector<128x128xbf16>
    %cst_27 = arith.constant dense<0.000000e+00> : vector<16x128xf32>
    %56 = tpu.matmul %54, %55, %cst_27 {dimension_numbers = #tpu.dot_dimension_numbers<[1], [0], [0], [1], [0, 0, 1, 1], [], []>} : vector<16x128xbf16>, vector<128x128xbf16>, vector<16x128xf32> -> vector<16x128xf32>
    %57 = vector.shape_cast %53 : vector<1x16x128xbf16> to vector<16x128xbf16>
    %c0_28 = arith.constant 0 : index
    %c0_29 = arith.constant 0 : index
    %58 = vector.load %arg8[%c0_28, %c0_29] : memref<128x128xbf16, #tpu.memory_space<vmem>>, vector<128x128xbf16>
    %cst_30 = arith.constant dense<0.000000e+00> : vector<16x128xf32>
    %59 = tpu.matmul %57, %58, %cst_30 {dimension_numbers = #tpu.dot_dimension_numbers<[1], [0], [0], [1], [0, 0, 1, 1], [], []>} : vector<16x128xbf16>, vector<128x128xbf16>, vector<16x128xf32> -> vector<16x128xf32>
    %60 = arith.addf %56, %59 : vector<16x128xf32>
    %61 = vector.shape_cast %52 : vector<1x16x128xbf16> to vector<16x128xbf16>
    %c0_31 = arith.constant 0 : index
    %c0_32 = arith.constant 0 : index
    %62 = vector.load %arg9[%c0_31, %c0_32] : memref<128x128xbf16, #tpu.memory_space<vmem>>, vector<128x128xbf16>
    %cst_33 = arith.constant dense<0.000000e+00> : vector<16x128xf32>
    %63 = tpu.matmul %61, %62, %cst_33 {dimension_numbers = #tpu.dot_dimension_numbers<[1], [0], [0], [1], [0, 0, 1, 1], [], []>} : vector<16x128xbf16>, vector<128x128xbf16>, vector<16x128xf32> -> vector<16x128xf32>
    %64 = arith.addf %60, %63 : vector<16x128xf32>
    %c0_34 = arith.constant 0 : index
    %c0_35 = arith.constant 0 : index
    %65 = vector.load %arg10[%c0_34, %c0_35] : memref<1x128xf32, #tpu.memory_space<vmem>>, vector<1x128xf32>
    %66 = vector.broadcast %65 : vector<1x128xf32> to vector<16x128xf32>
    %67 = arith.addf %64, %66 : vector<16x128xf32>
    %cst_36 = arith.constant 0.000000e+00 : f32
    %68 = vector.broadcast %cst_36 : f32 to vector<16x128xf32>
    %69 = arith.maximumf %67, %68 : vector<16x128xf32>
    %70 = arith.truncf %69 : vector<16x128xf32> to vector<16x128xbf16>
    %c0_37 = arith.constant 0 : index
    %c0_38 = arith.constant 0 : index
    %71 = vector.load %arg11[%c0_37, %c0_38] : memref<128x128xbf16, #tpu.memory_space<vmem>>, vector<128x128xbf16>
    %cst_39 = arith.constant dense<0.000000e+00> : vector<16x128xf32>
    %72 = tpu.matmul %70, %71, %cst_39 {dimension_numbers = #tpu.dot_dimension_numbers<[1], [0], [0], [1], [0, 0, 1, 1], [], []>} : vector<16x128xbf16>, vector<128x128xbf16>, vector<16x128xf32> -> vector<16x128xf32>
    %c0_40 = arith.constant 0 : index
    %c0_41 = arith.constant 0 : index
    %73 = vector.load %arg12[%c0_40, %c0_41] : memref<1x128xf32, #tpu.memory_space<vmem>>, vector<1x128xf32>
    %74 = vector.broadcast %73 : vector<1x128xf32> to vector<16x128xf32>
    %75 = arith.addf %72, %74 : vector<16x128xf32>
    %76 = arith.extf %1 : vector<16x128xbf16> to vector<16x128xf32>
    %77 = arith.addf %75, %76 : vector<16x128xf32>
    %cst_42 = arith.constant 0.000000e+00 : f32
    %78 = vector.broadcast %cst_42 : f32 to vector<16x128xf32>
    %79 = arith.maximumf %77, %78 : vector<16x128xf32>
    %80 = vector.shape_cast %79 : vector<16x128xf32> to vector<1x16x128xf32>
    %81 = arith.truncf %80 : vector<1x16x128xf32> to vector<1x16x128xbf16>
    %c0_43 = arith.constant 0 : index
    %c0_44 = arith.constant 0 : index
    %c0_45 = arith.constant 0 : index
    %82 = vector.load %arg13[%c0_43, %c0_44, %c0_45] : memref<1x16x128xbf16, #tpu.memory_space<vmem>>, vector<1x16x128xbf16>
    tpu.vector_store %arg13[%c0_43, %c0_44, %c0_45], %81 {strides = array<i32>} : memref<1x16x128xbf16, #tpu.memory_space<vmem>>, vector<1x16x128xbf16>,
    return
  }
  func.func @transform_0(%arg0: i32, %arg1: i32) -> (i32, i32, i32) {
    %c0_i32 = arith.constant 0 : i32
    %c0_i32_0 = arith.constant 0 : i32
    return %arg0, %arg1, %c0_i32 : i32, i32, i32
  }
  func.func @transform_1(%arg0: i32, %arg1: i32) -> (i32, i32, i32) {
    %c0_i32 = arith.constant 0 : i32
    %c0_i32_0 = arith.constant 0 : i32
    return %arg0, %arg1, %c0_i32 : i32, i32, i32
  }
  func.func @transform_2(%arg0: i32, %arg1: i32) -> (i32, i32, i32) {
    %c0_i32 = arith.constant 0 : i32
    %c0_i32_0 = arith.constant 0 : i32
    return %arg0, %arg1, %c0_i32 : i32, i32, i32
  }
  func.func @transform_3(%arg0: i32, %arg1: i32) -> (i32, i32) {
    %c0_i32 = arith.constant 0 : i32
    %c0_i32_0 = arith.constant 0 : i32
    %c0_i32_1 = arith.constant 0 : i32
    return %c0_i32, %c0_i32_0 : i32, i32
  }
  func.func @transform_4(%arg0: i32, %arg1: i32) -> (i32, i32) {
    %c0_i32 = arith.constant 0 : i32
    %c0_i32_0 = arith.constant 0 : i32
    %c0_i32_1 = arith.constant 0 : i32
    return %c0_i32, %c0_i32_0 : i32, i32
  }
  func.func @transform_5(%arg0: i32, %arg1: i32) -> (i32, i32) {
    %c0_i32 = arith.constant 0 : i32
    %c0_i32_0 = arith.constant 0 : i32
    %c0_i32_1 = arith.constant 0 : i32
    return %c0_i32, %c0_i32_0 : i32, i32
  }
  func.func @transform_6(%arg0: i32, %arg1: i32) -> (i32, i32) {
    %c0_i32 = arith.constant 0 : i32
    %c0_i32_0 = arith.constant 0 : i32
    %c0_i32_1 = arith.constant 0 : i32
    return %c0_i32, %c0_i32_0 : i32, i32
  }
  func.func @transform_7(%arg0: i32, %arg1: i32) -> (i32, i32) {
    %c0_i32 = arith.constant 0 : i32
    %c0_i32_0 = arith.constant 0 : i32
    %c0_i32_1 = arith.constant 0 : i32
    return %c0_i32, %c0_i32_0 : i32, i32
  }
  func.func @transform_8(%arg0: i32, %arg1: i32) -> (i32, i32) {
    %c0_i32 = arith.constant 0 : i32
    %c0_i32_0 = arith.constant 0 : i32
    %c0_i32_1 = arith.constant 0 : i32
    return %c0_i32, %c0_i32_0 : i32, i32
  }
  func.func @transform_9(%arg0: i32, %arg1: i32) -> (i32, i32) {
    %c0_i32 = arith.constant 0 : i32
    %c0_i32_0 = arith.constant 0 : i32
    %c0_i32_1 = arith.constant 0 : i32
    return %c0_i32, %c0_i32_0 : i32, i32
  }
  func.func @transform_10(%arg0: i32, %arg1: i32) -> (i32, i32) {
    %c0_i32 = arith.constant 0 : i32
    %c0_i32_0 = arith.constant 0 : i32
    %c0_i32_1 = arith.constant 0 : i32
    return %c0_i32, %c0_i32_0 : i32, i32
  }
  func.func @transform_11(%arg0: i32, %arg1: i32) -> (i32, i32, i32) {
    %c0_i32 = arith.constant 0 : i32
    %c0_i32_0 = arith.constant 0 : i32
    return %arg0, %arg1, %c0_i32 : i32, i32, i32
  }
}

</mosaic_0001>

<bundles_post_ra>
// kernel: tpu_custom_call.1
= control target key start
LH: loop header
LB: loop body
LE: loop exit
PB: predicated region body
PF: predicated region fallthrough
CT: control target
= control target key end

     0   :  { %s3044_s0 = inlined_call_operand.hbm [shape: bf16[2,16,128], index: 0, kind: input, shape index: {}]   ;;  %s3045_s1 = inlined_call_operand.hbm [shape: bf16[2,1,128], index: 1, kind: input, shape index: {}]   ;;  %s3046_s2 = inlined_call_operand.hbm [shape: bf16[2,1,128], index: 2, kind: input, shape index: {}]   ;;  %s3047_s3 = inlined_call_operand.hbm [shape: bf16[128,128], index: 3, kind: input, shape index: {}]   ;;  %s3048_s4 = inlined_call_operand.hbm [shape: f32[1,128], index: 4, kind: input, shape index: {}]   ;;  %s3049_s5 = inlined_call_operand.hbm [shape: bf16[128,128], index: 5, kind: input, shape index: {}]   ;;  %s3050_s6 = inlined_call_operand.hbm [shape: bf16[128,128], index: 6, kind: input, shape index: {}]   ;;  %s3051_s7 = inlined_call_operand.hbm [shape: bf16[128,128], index: 7, kind: input, shape index: {}]   ;;  %s3052_s8 = inlined_call_operand.hbm [shape: f32[1,128], index: 8, kind: input, shape index: {}]   ;;  %s3053_s9 = inlined_call_operand.hbm [shape: bf16[128,128], index: 9, kind: input, shape index: {}]   ;;  %s3054_s10 = inlined_call_operand.hbm [shape: f32[1,128], index: 10, kind: input, shape index: {}]   ;;  %s3055_s11 = inlined_call_operand.hbm [shape: bf16[2,16,128], index: 11, kind: output, shape index: {}]  }
   0x1   :  { %3081 = sst [smem:[#allocation35_spill]] %s3044_s0 }
   0x2   :  { %3082 = sst [smem:[#allocation36_spill]] %s3045_s1 }
   0x3   :  { %3083 = sst [smem:[#allocation37_spill]] %s3047_s3 }
   0x4   :  { %3084 = sst [smem:[#allocation38_spill]] %s3048_s4 }
   0x5   :  { %3085 = sst [smem:[#allocation39_spill]] %s3049_s5 }
   0x6   :  { %3086 = sst [smem:[#allocation40_spill]] %s3051_s7 }
   0x7   :  { %3087 = sst [smem:[#allocation41_spill]] %s3053_s9 }
   0x8   :  { %3088 = sst [smem:[#allocation42_spill]] %s3054_s10 }
   0x9   :  { %3089 = sst [smem:[#allocation43_spill]] %s3055_s11 }
   0xa   :  { %16 = vsyncpa [#allocation3], 0 }
   0xb   :  { %18 = vsyncpa [#allocation3 + $0x1], 0 }
   0xc   :  { %19 = vsyncpa [#allocation6], 0 }
   0xd   :  { %21 = vsyncpa [#allocation6 + $0x1], 0 }
   0xe   :  { %22 = vsyncpa [#allocation9], 0 }
   0xf   :  { %23 = vsyncpa [#allocation12], 0 }
  0x10   :  { %24 = vsyncpa [#allocation15], 0 }
  0x11   :  { %25 = vsyncpa [#allocation18], 0 }
  0x12   :  { %26 = vsyncpa [#allocation4], 0 }
  0x13   :  { %28 = vsyncpa [#allocation4 + $0x1], 0  ;;  %s2484_s17 = smov 0   ;;  %s2486_s18 = smov 0  }
  0x14   :  { %s2488_s19 = smov 0   ;;  %s2490_s20 = smov 0  }
  0x15   :  { %s2492_s21 = smov 0   ;;  %s2494_s22 = smov 0  }
  0x16 LB: > { %3090 = sst [smem:[#allocation28_spill]] %s2391_s19  ;;  %s2515_s23 = sadd.s32 4294967295, %s2403_s22   ;;  %s2403_s22 = sphi %s2494_s22, %s34_s22   ;;  %s2399_s21 = sphi %s2492_s21, %s3149_s21   ;;  %s2395_s20 = sphi %s2490_s20, %s3148_s20   ;;  %s2391_s19 = sphi %s2488_s19, %s3144_s19   ;;  %s2387_s18 = sphi %s2486_s18, %s3147_s18   ;;  %s2383_s17 = sphi %s2484_s17, %s3146_s17  }
  0x17   : > { %3091 = sst [smem:[#allocation29_spill]] %s2395_s20  ;;  %p1524_p0 = scmp.ge.s32.totalorder %s2403_s22, 1 }
  0x18   : > { %3092 = sst [smem:[#allocation30_spill]] %s2403_s22  ;;  %p3060_p1 = scmp.eq.s32.totalorder %s2515_s23, 0 }
  0x19   : > { %p331_p2 = scmp.lt.s32.totalorder %s2403_s22, 3  ;;  %s2405_s25 = smov [#allocation8]  }
  0x1a   : > { %s343_s26 = sshll.u32 %s2405_s25, 4  ;;  %s2406_s28 = smov [#allocation11]   ;;  %s2524_s26 = int_to_ptr.vmem [resolvable:$true] %s343_s26 }
  0x1b   : > { %p2520_p3 = pnand %p1524_p0, %p331_p2  ;;  %s367_s29 = sshll.u32 %s2406_s28, 4  ;;  %s2535_s29 = int_to_ptr.vmem [resolvable:$true] %s367_s29 }
  0x1c   : > { %s2407_s30 = smov [#allocation14]   ;;  %s3096_s3 = sld [smem:[#allocation37_spill]] }
  0x1d   : > { %s3093_s24 = scalar_select %p2520_p3, 1, 0 }
  0x1e   : > { %p1825_p4 = pneg %p2520_p3  ;;  %s2537_s12 = sshll.u32 %s2407_s30, 4  ;;  %s394_s12 = int_to_ptr.vmem [resolvable:$true] %s2537_s12 }
  0x1f   : > { %3094 = sst [smem:[#allocation31_spill]] %s3093_s24 }
  0x20   : > { %p2531_p6 = pnand %p1825_p4, %p3060_p1 }
  0x22   : > { %s3095_s27 = scalar_select %p2531_p6, 1, 0 }
  0x23   : > { %s1987_s15 = scalar_lea.hbm %s3096_s3, 1024  ;;  %p2547_p8 = pneg %p2531_p6 }
  0x24   : > { %p1988_p7 = scmp.ne.s32.totalorder %s3096_s3, %s1987_s15  ;;  %p1994_p11 = scmp.lt.u32.totalorder %s1987_s15, %s3096_s3 }
  0x25   : > { %s3097_s11 = scalar_select %p2547_p8, 1, 0 }
  0x26   : > { %p1990_p9 = pnand %p2547_p8, %p1988_p7 }
  0x28   : > { %p1991_p10 = pneg %p1990_p9 }
  0x2a   : > { %p1996_p12 = pnand %p1994_p11, %p1991_p10 }
  0x2c   : > { %1999 = shalt.err (!%p1996_p12)
}
  0x2d   : > { %s2000_s13 = scalar_lea.vmem %s2524_s26, 1024  ;;  %p2008_p4 = scmp.lt.s32.totalorder %s2524_s26, %s2524_s26 }
  0x2e   : > { %p2001_p13 = scmp.ne.s32.totalorder %s2524_s26, %s2000_s13  ;;  %p2009_p5 = scmp.lt.s32.totalorder %s2000_s13, %s2000_s13 }
  0x30   : > { %p2003_p0 = pnand %p2001_p13, %p2547_p8  ;;  %p2010_p7 = por %p2009_p5, %p2008_p4 }
  0x32   : > { %p2004_p2 = pneg %p2003_p0 }
  0x34   : > { %p2011_p9 = pnand %p2010_p7, %p2004_p2 }
  0x36   : > { %2014 = shalt.err (!%p2011_p9)
}
  0x37   : > { %s3062_s14 = smov 64   ;;  %s3064_s15 = smov 4  }
  0x38   : > { %1828 = dma.hbm_to_vmem [thread:$0]  (!%p2531_p6), %s3096_s3, 1024, %s2524_s26, [#allocation9], %s3062_s14, %s3062_s14, %s3064_s15  }
  0x39   : > { %s3098_s5 = sld [smem:[#allocation39_spill]] }
  0x3f   : > { %s2015_s13 = scalar_lea.hbm %s3098_s5, 1024 }
  0x40   : > { %p2016_p5 = scmp.ne.s32.totalorder %s3098_s5, %s2015_s13  ;;  %p2022_p12 = scmp.lt.u32.totalorder %s2015_s13, %s3098_s5 }
  0x42   : > { %p2018_p10 = pnand %p2016_p5, %p2547_p8 }
  0x44   : > { %p2019_p11 = pneg %p2018_p10 }
  0x46   : > { %p2024_p13 = pnand %p2022_p12, %p2019_p11 }
  0x48   : > { %2027 = shalt.err (!%p2024_p13)
}
  0x49   : > { %s2028_s26 = scalar_lea.vmem %s2535_s29, 1024  ;;  %p2036_p7 = scmp.lt.s32.totalorder %s2535_s29, %s2535_s29 }
  0x4a   : > { %p2029_p0 = scmp.ne.s32.totalorder %s2535_s29, %s2028_s26  ;;  %p2037_p9 = scmp.lt.s32.totalorder %s2028_s26, %s2028_s26 }
  0x4c   : > { %p2031_p2 = pnand %p2029_p0, %p2547_p8  ;;  %p2038_p5 = por %p2037_p9, %p2036_p7 }
  0x4e   : > { %p2032_p4 = pneg %p2031_p2 }
  0x50   : > { %p2039_p10 = pnand %p2038_p5, %p2032_p4 }
  0x52   : > { %2042 = shalt.err (!%p2039_p10)
}
  0x53   : > { %1834 = dma.hbm_to_vmem [thread:$0]  (!%p2531_p6), %s3098_s5, 1024, %s2535_s29, [#allocation12], %s3062_s14, %s3062_s14, %s3064_s15  }
  0x54   : > { %s3099_s7 = sld [smem:[#allocation40_spill]] }
  0x5a   : > { %s2043_s16 = scalar_lea.hbm %s3099_s7, 1024 }
  0x5b   : > { %p2044_p11 = scmp.ne.s32.totalorder %s3099_s7, %s2043_s16  ;;  %p2050_p0 = scmp.lt.u32.totalorder %s2043_s16, %s3099_s7 }
  0x5d   : > { %p2046_p12 = pnand %p2044_p11, %p2547_p8 }
  0x5f   : > { %p2047_p13 = pneg %p2046_p12 }
  0x61   : > { %p2052_p2 = pnand %p2050_p0, %p2047_p13 }
  0x63   : > { %2055 = shalt.err (!%p2052_p2)
}
  0x64   : > { %s2056_s26 = scalar_lea.vmem %s394_s12, 1024  ;;  %p2064_p5 = scmp.lt.s32.totalorder %s394_s12, %s394_s12 }
  0x65   : > { %p2057_p4 = scmp.ne.s32.totalorder %s394_s12, %s2056_s26  ;;  %p2065_p10 = scmp.lt.s32.totalorder %s2056_s26, %s2056_s26 }
  0x67   : > { %p2059_p7 = pnand %p2057_p4, %p2547_p8  ;;  %p2066_p1 = por %p2065_p10, %p2064_p5 }
  0x69   : > { %p2060_p9 = pneg %p2059_p7 }
  0x6b   : > { %p2067_p3 = pnand %p2066_p1, %p2060_p9 }
  0x6d   : > { %2070 = shalt.err (!%p2067_p3)
}
  0x6e   : > { %1840 = dma.hbm_to_vmem [thread:$0]  (!%p2531_p6), %s3099_s7, 1024, %s394_s12, [#allocation15], %s3062_s14, %s3062_s14, %s3064_s15  }
  0x6f   : > { %s2410_s10 = smov [#allocation17]   ;;  %s3100_s9 = sld [smem:[#allocation41_spill]] }
  0x70   : > { %s417_s20 = sshll.u32 %s2410_s10, 4  ;;  %s418_s20 = int_to_ptr.vmem [resolvable:$true] %s417_s20 }
  0x75   : > { %s2071_s25 = scalar_lea.hbm %s3100_s9, 1024 }
  0x76   : > { %p2072_p1 = scmp.ne.s32.totalorder %s3100_s9, %s2071_s25  ;;  %p2078_p12 = scmp.lt.u32.totalorder %s2071_s25, %s3100_s9 }
  0x78   : > { %p2074_p3 = pnand %p2072_p1, %p2547_p8 }
  0x7a   : > { %p2075_p11 = pneg %p2074_p3 }
  0x7c   : > { %p2080_p13 = pnand %p2078_p12, %p2075_p11 }
  0x7e   : > { %2083 = shalt.err (!%p2080_p13)
}
  0x7f   : > { %s2084_s12 = scalar_lea.vmem %s418_s20, 1024  ;;  %p2092_p7 = scmp.lt.s32.totalorder %s418_s20, %s418_s20 }
  0x80   : > { %p2085_p0 = scmp.ne.s32.totalorder %s418_s20, %s2084_s12  ;;  %p2093_p9 = scmp.lt.s32.totalorder %s2084_s12, %s2084_s12 }
  0x82   : > { %p2087_p2 = pnand %p2085_p0, %p2547_p8  ;;  %p2094_p5 = por %p2093_p9, %p2092_p7 }
  0x84   : > { %p2088_p4 = pneg %p2087_p2 }
  0x86   : > { %p2095_p10 = pnand %p2094_p5, %p2088_p4 }
  0x88   : > { %2098 = shalt.err (!%p2095_p10)
}
  0x89   : > { %1846 = dma.hbm_to_vmem [thread:$0]  (!%p2531_p6), %s3100_s9, 1024, %s418_s20, [#allocation18], %s3062_s14, %s3062_s14, %s3064_s15  }
  0x8a   : > { %s1523_s10 = sadd.s32 4294967294, %s2403_s22   ;;  %s46_s24 = sadd.s32 1, %s2399_s21 }
  0x8b   : > { %p48_p1 = scmp.ge.s32.totalorder %s46_s24, 2  ;;  %s55_s16 = sadd.s32 1, %s2391_s19 }
  0x8c   : > { %p62_p3 = scmp.ne.s32.totalorder %s2391_s19, %s2387_s18  ;;  %p63_p11 = scmp.eq.s32.totalorder %s2403_s22, 0 }
  0x8d   : > { %s3151_s24 = smov (%p48_p1, %s46_s24), 0  ;;  %p68_p13 = scmp.ne.s32.totalorder %s2387_s18, %s2383_s17 }
  0x8e   : > { %3101 = sst [smem:[#allocation32_spill]] %s3151_s24  ;;  %p2648_p12 = por %p63_p11, %p62_p3 }
  0x8f   : > { %s50_s20 = ssub.s32 %s2399_s21, %s3151_s24  ;;  %p318_p0 = scmp.eq.s32.totalorder %s2515_s23, 1 }
  0x90   : > { %p53_p2 = scmp.eq.s32.totalorder %s50_s20, 0  ;;  %p3103_p4 = scmp.eq.s32.totalorder %s2515_s23, 0 }
  0x91   : > { %p2663_p9 = por %p318_p0, %p62_p3  ;;  %p324_p5 = scmp.eq.s32.totalorder %s1523_s10, 1 }
  0x92   : > { %p2659_p7 = por %p3103_p4, %p68_p13  ;;  %p1872_p1 = scmp.lt.s32.totalorder %s2403_s22, 2 }
  0x93   : > { %s3105_s30 = scalar_select %p2663_p9, 1, 0 }
  0x94   : > { %s3104_s28 = scalar_select %p2659_p7, 1, 0 }
  0x95   : > { %s2668_s13 = scalar_select %p53_p2, %s2391_s19, %s55_s16  }
  0x96   : > { %p2670_p10 = por %p324_p5, %p68_p13  ;;  %s2676_s12 = sand.u32 1, %s2391_s19  }
  0x97   : > { %3106 = sst [smem:[#allocation33_spill]] %s2668_s13  ;;  %s465_s29 = sand.u32 1, %s2403_s22  }
  0x98   : > { %s3107_s26 = scalar_select %p2670_p10, 1, 0 }
  0x99   : > { %p2681_p11 = pnand %p1872_p1, %p2648_p12  ;;  %s1537_s20 = sshll.u32 %s2399_s21, 4 }
  0x9a   : > { %3108 = sst [smem:[#allocation34_spill]] %s3107_s26  ;;  %s3110_s1 = sld [smem:[#allocation36_spill]] }
  0x9b   : > { %s3109_s0 = scalar_select %p2681_p11, 1, 0 }
  0x9c   : > { %s468_s15 = scalar_lea.vmem [#allocation5], %s2676_s12  ;;  %s2695_s25 = scalar_lea.hbm %s3046_s2, %s1537_s20 }
  0x9d   : > { %s476_s3 = sshll.u32 %s468_s15, 4  ;;  %s2699_s9 = scalar_lea.sflag [#allocation6], %s465_s29  ;;  %s2697_s3 = int_to_ptr.vmem [resolvable:$true] %s476_s3 }
  0x9e   : > { %p2705_p12 = pneg %p2681_p11 }
  0xa0   : > { %s2689_s16 = scalar_lea.hbm %s3110_s1, %s1537_s20  ;;  %s2104_s5 = scalar_lea.hbm %s3110_s1, 32 }
  0xa1   : > { %s2099_s24 = scalar_lea.hbm %s2689_s16, 16  ;;  %p2105_p2 = scmp.lt.u32.totalorder %s2689_s16, %s3110_s1 }
  0xa2   : > { %p2100_p3 = scmp.ne.s32.totalorder %s2689_s16, %s2099_s24  ;;  %p2106_p4 = scmp.lt.u32.totalorder %s2104_s5, %s2099_s24 }
  0xa3   : > { %s3111_s14 = scalar_select %p2705_p12, 1, 0 }
  0xa4   : > { %p2102_p13 = pnand %p2705_p12, %p2100_p3  ;;  %p2107_p5 = por %p2106_p4, %p2105_p2 }
  0xa5   : > { %p2108_p1 = scmp.lt.u32.totalorder %s2099_s24, %s2689_s16 }
  0xa6   : > { %p2103_p0 = pneg %p2102_p13 }
  0xa7   : > { %p2109_p10 = por %p2108_p1, %p2107_p5 }
  0xa9   : > { %p2110_p9 = pnand %p2109_p10, %p2103_p0 }
  0xab   : > { %2113 = shalt.err (!%p2110_p9)
}
  0xac   : > { %s2114_s29 = scalar_lea.vmem %s2697_s3, 16  ;;  %s2411_s15 = smov [#allocation5]  }
  0xad   : > { %p2115_p3 = scmp.ne.s32.totalorder %s2697_s3, %s2114_s29  ;;  %s2119_s10 = sshll.u32 %s2411_s15, 4  ;;  %s2120_s10 = int_to_ptr.vmem [resolvable:$false] %s2119_s10 }
  0xae   : > { %s2121_s7 = scalar_lea.vmem %s2120_s10, 32  ;;  %p2122_p6 = scmp.lt.s32.totalorder %s2697_s3, %s2120_s10 }
  0xaf   : > { %p2117_p13 = pnand %p2115_p3, %p2705_p12  ;;  %p2123_p8 = scmp.lt.s32.totalorder %s2121_s7, %s2114_s29 }
  0xb1   : > { %p2118_p7 = pneg %p2117_p13  ;;  %p2124_p2 = por %p2123_p8, %p2122_p6 }
  0xb3   : > { %p2125_p4 = pnand %p2124_p2, %p2118_p7 }
  0xb5   : > { %2128 = shalt.err (!%p2125_p4)
}
  0xb6   : > { %1856 = dma.hbm_to_vmem [thread:$0]  (!%p2681_p11), %s2689_s16, 16, %s2697_s3, %s2699_s9  }
  0xb7   : > { %s2412_s24 = smov [#allocation10]   ;;  %s2413_s20 = smov [#allocation13]  }
  0xb8   : > { %s357_s5 = sshll.u32 %s2412_s24, 4  ;;  %s380_s1 = sshll.u32 %s2413_s20, 4  ;;  %s358_s5 = int_to_ptr.vmem [resolvable:$true] %s357_s5  ;;  %s381_s1 = int_to_ptr.vmem [resolvable:$true] %s380_s1 }
  0xb9   : > { %s3112_s4 = sld [smem:[#allocation38_spill]]  ;;  %p3113_p8 = scmp.ne.s32.totalorder %s3097_s11, 0 }
  0xbf   : > { %s2129_s10 = scalar_lea.hbm %s3112_s4, 16 }
  0xc0   : > { %p2130_p6 = scmp.ne.s32.totalorder %s3112_s4, %s2129_s10  ;;  %p2136_p10 = scmp.lt.u32.totalorder %s2129_s10, %s3112_s4 }
  0xc2   : > { %p2132_p7 = pnand %p2130_p6, %p3113_p8 }
  0xc4   : > { %p2133_p9 = pneg %p2132_p7 }
  0xc6   : > { %p2138_p0 = pnand %p2136_p10, %p2133_p9 }
  0xc8   : > { %2141 = shalt.err (!%p2138_p0)
}
  0xc9   : > { %s2142_s3 = scalar_lea.vmem %s358_s5, 16  ;;  %s2149_s13 = scalar_lea.vmem %s358_s5, 32 }
  0xca   : > { %p2143_p5 = scmp.ne.s32.totalorder %s358_s5, %s2142_s3  ;;  %p2150_p13 = scmp.lt.s32.totalorder %s358_s5, %s358_s5 }
  0xcb   : > { %p2151_p2 = scmp.lt.s32.totalorder %s2149_s13, %s2142_s3 }
  0xcc   : > { %p2145_p1 = pnand %p2143_p5, %p3113_p8 }
  0xcd   : > { %p2152_p4 = por %p2151_p2, %p2150_p13 }
  0xce   : > { %p2146_p3 = pneg %p2145_p1 }
  0xd0   : > { %p2153_p11 = pnand %p2152_p4, %p2146_p3 }
  0xd2   : > { %2156 = shalt.err (!%p2153_p11)
}
  0xd3   : > { %p3114_p6 = scmp.ne.s32.totalorder %s3095_s27, 0  ;;  %s2157_s20 = scalar_lea.hbm %s3050_s6, 1024 }
  0xd4   : > { %p2158_p7 = scmp.ne.s32.totalorder %s3050_s6, %s2157_s20  ;;  %p2164_p11 = scmp.lt.u32.totalorder %s2157_s20, %s3050_s6 }
  0xd5   : > { %1831 = dma.hbm_to_vmem [thread:$0]  (!%p3114_p6), %s3112_s4, 16, %s358_s5, [#allocation9]  }
  0xd6   : > { %p2160_p9 = pnand %p2158_p7, %p3113_p8 }
  0xd8   : > { %p2161_p10 = pneg %p2160_p9 }
  0xda   : > { %p2166_p0 = pnand %p2164_p11, %p2161_p10 }
  0xdc   : > { %2169 = shalt.err (!%p2166_p0)
}
  0xdd   : > { %s2170_s3 = scalar_lea.vmem %s381_s1, 1024  ;;  %p2178_p13 = scmp.lt.s32.totalorder %s381_s1, %s381_s1 }
  0xde   : > { %p2171_p5 = scmp.ne.s32.totalorder %s381_s1, %s2170_s3  ;;  %p2179_p2 = scmp.lt.s32.totalorder %s2170_s3, %s2170_s3 }
  0xe0   : > { %p2173_p1 = pnand %p2171_p5, %p3113_p8  ;;  %p2180_p4 = por %p2179_p2, %p2178_p13 }
  0xe2   : > { %p2174_p3 = pneg %p2173_p1 }
  0xe4   : > { %p2181_p12 = pnand %p2180_p4, %p2174_p3 }
  0xe6   : > { %2184 = shalt.err (!%p2181_p12)
}
  0xe7   : > { %s3115_s5 = smov 4   ;;  %s3116_s13 = smov 64  }
  0xe8   : > { %1837 = dma.hbm_to_vmem [thread:$0]  (!%p3114_p6), %s3050_s6, 1024, %s381_s1, [#allocation12], %s3116_s13, %s3116_s13, %s3115_s5  }
  0xe9   : > { %s2414_s19 = smov [#allocation16]   ;;  %s2415_s20 = smov [#allocation19]  }
  0xea   : > { %s407_s22 = sshll.u32 %s2414_s19, 4  ;;  %s431_s15 = sshll.u32 %s2415_s20, 4  ;;  %s408_s22 = int_to_ptr.vmem [resolvable:$true] %s407_s22  ;;  %s432_s15 = int_to_ptr.vmem [resolvable:$true] %s431_s15 }
  0xeb   : > { %s2185_s7 = scalar_lea.hbm %s3052_s8, 16 }
  0xec   : > { %p2186_p12 = scmp.ne.s32.totalorder %s3052_s8, %s2185_s7  ;;  %p2192_p10 = scmp.lt.u32.totalorder %s2185_s7, %s3052_s8 }
  0xee   : > { %p2188_p7 = pnand %p2186_p12, %p3113_p8 }
  0xf0   : > { %p2189_p9 = pneg %p2188_p7 }
  0xf2   : > { %p2194_p11 = pnand %p2192_p10, %p2189_p9 }
  0xf4   : > { %2197 = shalt.err (!%p2194_p11)
}
  0xf5   : > { %s2198_s1 = scalar_lea.vmem %s408_s22, 16  ;;  %s2205_s24 = scalar_lea.vmem %s408_s22, 32 }
  0xf6   : > { %p2199_p0 = scmp.ne.s32.totalorder %s408_s22, %s2198_s1  ;;  %p2206_p3 = scmp.lt.s32.totalorder %s408_s22, %s408_s22 }
  0xf7   : > { %p2207_p13 = scmp.lt.s32.totalorder %s2205_s24, %s2198_s1 }
  0xf8   : > { %p2201_p5 = pnand %p2199_p0, %p3113_p8 }
  0xf9   : > { %p2208_p2 = por %p2207_p13, %p2206_p3 }
  0xfa   : > { %p2202_p1 = pneg %p2201_p5 }
  0xfc   : > { %p2209_p4 = pnand %p2208_p2, %p2202_p1 }
  0xfe   : > { %2212 = shalt.err (!%p2209_p4)
}
  0xff   : > { %1843 = dma.hbm_to_vmem [thread:$0]  (!%p3114_p6), %s3052_s8, 16, %s408_s22, [#allocation15]  }
 0x100   : > { %s3117_s10 = sld [smem:[#allocation42_spill]] }
 0x106   : > { %s2213_s29 = scalar_lea.hbm %s3117_s10, 16 }
 0x107   : > { %p2214_p12 = scmp.ne.s32.totalorder %s3117_s10, %s2213_s29  ;;  %p2220_p10 = scmp.lt.u32.totalorder %s2213_s29, %s3117_s10 }
 0x109   : > { %p2216_p7 = pnand %p2214_p12, %p3113_p8 }
 0x10b   : > { %p2217_p9 = pneg %p2216_p7 }
 0x10d   : > { %p2222_p11 = pnand %p2220_p10, %p2217_p9 }
 0x10f   : > { %2225 = shalt.err (!%p2222_p11)
}
 0x110   : > { %s2226_s24 = scalar_lea.vmem %s432_s15, 16  ;;  %s2233_s22 = scalar_lea.vmem %s432_s15, 32 }
 0x111   : > { %p2227_p0 = scmp.ne.s32.totalorder %s432_s15, %s2226_s24  ;;  %p2234_p3 = scmp.lt.s32.totalorder %s432_s15, %s432_s15 }
 0x112   : > { %p2235_p13 = scmp.lt.s32.totalorder %s2233_s22, %s2226_s24 }
 0x113   : > { %p2229_p5 = pnand %p2227_p0, %p3113_p8 }
 0x114   : > { %p2236_p2 = por %p2235_p13, %p2234_p3 }
 0x115   : > { %p2230_p1 = pneg %p2229_p5 }
 0x117   : > { %p2237_p4 = pnand %p2236_p2, %p2230_p1 }
 0x119   : > { %2240 = shalt.err (!%p2237_p4)
}
 0x11a   : > { %1849 = dma.hbm_to_vmem [thread:$0]  (!%p3114_p6), %s3117_s10, 16, %s432_s15, [#allocation18]  }
 0x11b   : > { %s1534_s11 = sshll.u32 %s2676_s12, 3  ;;  %s1602_s26 = sshll.u32 %s2399_s21, 7 }
 0x11c   : > { %s3118_s7 = sld [smem:[#allocation35_spill]]  ;;  %s446_s27 = scalar_lea.vmem [#allocation2], %s1534_s11 }
 0x11d   : > { %s455_s16 = sshll.u32 %s446_s27, 4  ;;  %s486_s1 = scalar_lea.vmem [#allocation7], %s2676_s12  ;;  %s2811_s16 = int_to_ptr.vmem [resolvable:$true] %s455_s16 }
 0x11e   : > { %s2814_s24 = sshll.u32 %s486_s1, 4  ;;  %s443_s22 = scalar_lea.sflag [#allocation3], %s2676_s12  ;;  %s495_s24 = int_to_ptr.vmem [resolvable:$true] %s2814_s24 }
 0x11f   : > { %p3119_p6 = scmp.ne.s32.totalorder %s3111_s14, 0 }
 0x122   : > { %s2809_s3 = scalar_lea.hbm %s3118_s7, %s1602_s26  ;;  %s2246_s26 = scalar_lea.hbm %s3118_s7, 256 }
 0x123   : > { %s2241_s15 = scalar_lea.hbm %s2809_s3, 128  ;;  %p2247_p9 = scmp.lt.u32.totalorder %s2809_s3, %s3118_s7 }
 0x124   : > { %p2242_p8 = scmp.ne.s32.totalorder %s2809_s3, %s2241_s15  ;;  %p2248_p10 = scmp.lt.u32.totalorder %s2246_s26, %s2241_s15 }
 0x125   : > { %p2250_p0 = scmp.lt.u32.totalorder %s2241_s15, %s2809_s3 }
 0x126   : > { %p2244_p12 = pnand %p2242_p8, %p3119_p6  ;;  %p2249_p11 = por %p2248_p10, %p2247_p9 }
 0x128   : > { %p2245_p7 = pneg %p2244_p12  ;;  %p2251_p5 = por %p2250_p0, %p2249_p11 }
 0x12a   : > { %p2252_p1 = pnand %p2251_p5, %p2245_p7 }
 0x12c   : > { %2255 = shalt.err (!%p2252_p1)
}
 0x12d   : > { %s2256_s11 = scalar_lea.vmem %s2811_s16, 128  ;;  %s2416_s27 = smov [#allocation2]  }
 0x12e   : > { %p2257_p3 = scmp.ne.s32.totalorder %s2811_s16, %s2256_s11  ;;  %s2261_s1 = sshll.u32 %s2416_s27, 4  ;;  %s2262_s1 = int_to_ptr.vmem [resolvable:$false] %s2261_s1 }
 0x12f   : > { %s2263_s4 = scalar_lea.vmem %s2262_s1, 256  ;;  %p2264_p4 = scmp.lt.s32.totalorder %s2811_s16, %s2262_s1 }
 0x130   : > { %p2259_p13 = pnand %p2257_p3, %p3119_p6  ;;  %p2265_p8 = scmp.lt.s32.totalorder %s2263_s4, %s2256_s11 }
 0x132   : > { %p2260_p2 = pneg %p2259_p13  ;;  %p2266_p12 = por %p2265_p8, %p2264_p4 }
 0x134   : > { %p2267_p9 = pnand %p2266_p12, %p2260_p2 }
 0x136   : > { %2270 = shalt.err (!%p2267_p9)
}
 0x137   : > { %p3120_p7 = scmp.ne.s32.totalorder %s3109_s0, 0  ;;  %s2271_s15 = scalar_lea.hbm %s2695_s25, 16 }
 0x138   : > { %p2272_p10 = scmp.ne.s32.totalorder %s2695_s25, %s2271_s15  ;;  %s2276_s20 = scalar_lea.hbm %s3046_s2, 32 }
 0x139   : > { %1853 = dma.hbm_to_vmem [thread:$0]  (!%p3120_p7), %s2809_s3, 128, %s2811_s16, %s443_s22, %s3116_s13, %s3116_s13, %s3115_s5  }
 0x13a   : > { %p2274_p11 = pnand %p2272_p10, %p3119_p6  ;;  %p2277_p5 = scmp.lt.u32.totalorder %s2695_s25, %s3046_s2 }
 0x13b   : > { %p2278_p1 = scmp.lt.u32.totalorder %s2276_s20, %s2271_s15  ;;  %p2280_p13 = scmp.lt.u32.totalorder %s2271_s15, %s2695_s25 }
 0x13c   : > { %p2275_p0 = pneg %p2274_p11 }
 0x13d   : > { %p2279_p3 = por %p2278_p1, %p2277_p5 }
 0x13f   : > { %p2281_p2 = por %p2280_p13, %p2279_p3 }
 0x141   : > { %p2282_p4 = pnand %p2281_p2, %p2275_p0 }
 0x143   : > { %2285 = shalt.err (!%p2282_p4)
}
 0x144   : > { %s2286_s5 = scalar_lea.vmem %s495_s24, 16  ;;  %s2417_s13 = smov [#allocation7]  }
 0x145   : > { %p2287_p8 = scmp.ne.s32.totalorder %s495_s24, %s2286_s5  ;;  %s2291_s3 = sshll.u32 %s2417_s13, 4  ;;  %s2292_s3 = int_to_ptr.vmem [resolvable:$false] %s2291_s3 }
 0x146   : > { %s2293_s16 = scalar_lea.vmem %s2292_s3, 32  ;;  %p2294_p10 = scmp.lt.s32.totalorder %s495_s24, %s2292_s3 }
 0x147   : > { %p2289_p12 = pnand %p2287_p8, %p3119_p6  ;;  %p2295_p11 = scmp.lt.s32.totalorder %s2293_s16, %s2286_s5 }
 0x149   : > { %p2290_p9 = pneg %p2289_p12  ;;  %p2296_p7 = por %p2295_p11, %p2294_p10 }
 0x14b   : > { %p2297_p1 = pnand %p2296_p7, %p2290_p9 }
 0x14d   : > { %2300 = shalt.err (!%p2297_p1)
}
 0x14e   : > { %p3121_p5 = scmp.ne.s32.totalorder %s3109_s0, 0  ;;  %s3122_s22 = sld [smem:[#allocation31_spill]] }
 0x150   : > { %1859 = dma.hbm_to_vmem [thread:$0]  (!%p3121_p5), %s2695_s25, 16, %s495_s24, %s2699_s9  }
 0x154   : > { %p3123_p0 = scmp.ne.s32.totalorder %s3122_s22, 0 }
 0x155   : > { %s2865_s14 = sand.u32 (!%p3123_p0), 1, %s2387_s18   ;;  %p3124_p6 = scmp.ne.s32.totalorder (!%p3123_p0), %s3104_s28, 0 }
 0x156   : > { %503 = sbr.rel (%p3123_p0) target bundleno = 1111 (0x457), region = 64  ;;  %s1540_s11 = sshll.u32 (!%p3123_p0), %s2865_s14, 3 }
 0x157   : > { %s506_s27 = scalar_lea.sflag (!%p3123_p0), [#allocation3], %s2865_s14  ;;  %s2871_s1 = scalar_lea.vmem (!%p3123_p0), [#allocation2], %s1540_s11 }
 0x15d   : > { %2354 = dma.done.wait (%p3124_p6), %s506_s27, 128  }
 0x15e   : > { %2356 = vsyncadd (%p3124_p6), %s506_s27, 4294967168  ;;  %s514_s9 = sand.u32 1, %s2515_s23   ;;  %s517_s25 = scalar_lea.vmem [#allocation5], %s2865_s14 }
 0x15f   : > { %s515_s0 = scalar_lea.sflag [#allocation6], %s514_s9 }
 0x160   : > { %2358 = dma.done.wait (%p3124_p6), %s515_s0, 32  }
 0x161   : > { %2360 = vsyncadd (%p3124_p6), %s515_s0, 4294967264  ;;  %s525_s24 = scalar_lea.vmem [#allocation7], %s2865_s14  ;;  %p3125_p7 = scmp.eq.s32.totalorder %s2515_s23, 0 }
 0x163   : > { %2362 = dma.done.wait (%p3125_p7), [#allocation9], 1040   ;;  %p3126_p3 = pmov %p3125_p7 }
 0x165   : > { %2364 = vsyncadd (%p3126_p3), [#allocation9], 4294966256  ;;  %p3127_p13 = pmov %p3126_p3 }
 0x166   : > { %p3128_p2 = pmov %p3126_p3 }
 0x167   : > { %2366 = dma.done.wait (%p3127_p13), [#allocation12], 2048  }
 0x168   : > { %2368 = vsyncadd (%p3128_p2), [#allocation12], 4294965248  ;;  %p3129_p4 = pmov %p3128_p2 }
 0x169   : > { %p3130_p8 = pmov %p3128_p2 }
 0x16a   : > { %2370 = dma.done.wait (%p3129_p4), [#allocation15], 1040  }
 0x16b   : > { %2372 = vsyncadd (%p3130_p8), [#allocation15], 4294966256  ;;  %p3131_p12 = pmov %p3128_p2 }
 0x16c   : > { %p3132_p9 = pmov %p3128_p2 }
 0x16d   : > { %2374 = dma.done.wait (%p3131_p12), [#allocation18], 1040  }
 0x16e   : > { %2376 = vsyncadd (%p3132_p9), [#allocation18], 4294966256  ;;  %v2418_v0 = vmov 0.0   ;;  %vm2419_vm0 = vmmov 0   ;;  %v1945_v1 = vld [vmem:[#allocation8] sm:$0xff]   ;;  %v1946_v2 = vld [vmem:[#allocation8 + $0x8] sm:$0xff]   ;;  %v742_v5 = vlaneseq }
 0x16f   : > { %1665 = vmatprep.subr.bf16.mxu0 %v2418_v0  ;;  %1681 = vmatprep.mubr.msk.bf16.mxu0 %vm2419_vm0, %v2418_v0  ;;  %v2420_v3 = vmov 1966171168   ;;  %v1947_v6 = vld [vmem:[#allocation8 + $0x10] sm:$0xff]   ;;  %v1948_v9 = vld [vmem:[#allocation8 + $0x18] sm:$0xff]   ;;  %v1949_v12 = vld [vmem:[#allocation8 + $0x20] sm:$0xff]   ;;  %vm750_vm1 = vcmask 1040384  }
 0x170   : > { %1685 = vmatprep.subr.bf16.mxu1 %v2418_v0  ;;  %1701 = vmatprep.mubr.msk.bf16.mxu1 %vm2419_vm0, %v2418_v0  ;;  %v740_v4 = vunpack.c.l.s4 %v2420_v3  ;;  %v2910_v8 = vshrl.u32 %v742_v5, 7  ;;  %v1560_v10 = vld.sshfl [vmem:[%s525_s24] sm:$0x1 pattern:$0x75316420]  ;;  %v1951_v15 = vld [vmem:[#allocation8 + $0x30] sm:$0xff]  }
 0x171   : > { %1666 = vmatpush3.bf16.msra.mxu0 %v1945_v1  ;;  %1686 = vmatpush3.bf16.msra.mxu1 %v1945_v1  ;;  %vm751_vm2 = vsmask.f32 256  ;;  %v1950_v14 = vld [vmem:[#allocation8 + $0x28] sm:$0xff]   ;;  %v1952_v18 = vld [vmem:[#allocation8 + $0x38] sm:$0xff]   ;;  %v1550_v38 = vld [vmem:[#allocation10] ss:$0 sm:$0xff] }
 0x172   : > { %1667 = vmatprep.subr.bf16.mxu0 %v2418_v0  ;;  %1687 = vmatprep.subr.bf16.mxu1 %v2418_v0  ;;  %v741_v7 = vunpack.c.0.s8 %v740_v4  ;;  %vm2921_vm3 = vmand %vm750_vm1, %vm751_vm2  ;;  %v2928_v19 = vld [vmem:[%s2871_s1] sm:$0xff]   ;;  %v1954_v21 = vld [vmem:[#allocation13] sm:$0xff]   ;;  %v823_v43 = vsub.s32 0, %v2910_v8  ;;  %v809_v46 = vadd.s32 8, %v2910_v8  ;;  %v841_v47 = vsub.s32 1, %v2910_v8  ;;  %s3135_s23 = sld [smem:[#allocation29_spill]] }
 0x173   : > { %v729_v20 = vld [vmem:[%s517_s25] sm:$0x1]  ;;  %v1956_v22 = vld [vmem:[#allocation11] sm:$0xff]   ;;  %v1957_v26 = vld [vmem:[#allocation13 + $0x10] sm:$0xff]   ;;  %vm814_vm4 = vcmp.lt.s32.totalorder %v2910_v8, 1  ;;  %vm832_vm5 = vcmp.lt.s32.totalorder %v2910_v8, 7 }
 0x174   : > { %v744_v11 = vsub.s32 %v741_v7, %v2910_v8  ;;  %v1955_v24 = vld [vmem:[#allocation13 + $0x8] sm:$0xff]   ;;  %v1960_v27 = vld [vmem:[#allocation11 + $0x10] sm:$0xff]   ;;  %v1959_v28 = vld [vmem:[#allocation13 + $0x18] sm:$0xff]   ;;  %v824_v54 = vrot.slane %v2418_v0, %v823_v43  ;;  %vm810_vm6 = vcmp.eq.s32.totalorder %v2910_v8, 0  ;;  %vm829_vm7 = vcmp.eq.s32.totalorder %v809_v46, 15  ;;  %s603_s4 = scalar_lea.vmem [#allocation20], %s1540_s11 }
 0x175   : > { %1668 = vmatpush3.bf16.msra.mxu0 %v1946_v2  ;;  %1688 = vmatpush3.bf16.msra.mxu1 %v1946_v2  ;;  %v1958_v25 = vld [vmem:[#allocation11 + $0x8] sm:$0xff]   ;;  %v1962_v29 = vld [vmem:[#allocation11 + $0x18] sm:$0xff]   ;;  %v1961_v30 = vld [vmem:[#allocation13 + $0x20] sm:$0xff]   ;;  %v842_v57 = vrot.slane %v2418_v0, %v841_v47  ;;  %s1320_s15 = sshll.u32 %s603_s4, 4  ;;  %s3136_s20 = sld [smem:[#allocation43_spill]]  ;;  %s2995_s15 = int_to_ptr.vmem [resolvable:$true] %s1320_s15 }
 0x176   : > { %1669 = vmatprep.subr.bf16.mxu0 %v2418_v0  ;;  %1689 = vmatprep.subr.bf16.mxu1 %v2418_v0  ;;  %v745_v13 = vrot.slane %v1560_v10, %v744_v11  ;;  %v1964_v31 = vld [vmem:[#allocation11 + $0x20] sm:$0xff]   ;;  %v1963_v32 = vld [vmem:[#allocation13 + $0x28] sm:$0xff]   ;;  %v1965_v33 = vld [vmem:[#allocation13 + $0x30] sm:$0xff]   ;;  %s1305_s5 = scalar_lea.sflag [#allocation4], %s2865_s14  ;;  %s2301_s13 = scalar_lea.vmem %s2995_s15, 128 }
 0x177   : > { %v1966_v34 = vld [vmem:[#allocation11 + $0x28] sm:$0xff]   ;;  %v1967_v35 = vld [vmem:[#allocation13 + $0x38] sm:$0xff]   ;;  %v1968_v36 = vld [vmem:[#allocation11 + $0x30] sm:$0xff]   ;;  %p2302_p10 = scmp.ne.s32.totalorder %s2995_s15, %s2301_s13  ;;  %p3138_p11 = scmp.ne.s32.totalorder %s3105_s30, 0 }
 0x178   : > { %v747_v16 = vshll.u32 %v745_v13, 16  ;;  %v1970_v37 = vld [vmem:[#allocation11 + $0x38] sm:$0xff]   ;;  %v1969_v56 = vld [vmem:[#allocation14] sm:$0xff]   ;;  %v1971_v4 = vld [vmem:[#allocation14 + $0x8] sm:$0xff]   ;;  %s1605_s28 = sshll.u32 %s3135_s23, 7  ;;  %s2421_s3 = smov [#allocation20]  }
 0x179   : > { %1670 = vmatpush3.bf16.msra.mxu0 %v1947_v6  ;;  %1690 = vmatpush3.bf16.msra.mxu1 %v1947_v6  ;;  %v1972_v8 = vld [vmem:[#allocation14 + $0x10] sm:$0xff]   ;;  %v1974_v10 = vld [vmem:[#allocation14 + $0x20] sm:$0xff]   ;;  %v1975_v11 = vld [vmem:[#allocation14 + $0x28] sm:$0xff]   ;;  %p2303_p1 = pnand %p2302_p10, %p3138_p11  ;;  %s2305_s16 = sshll.u32 %s2421_s3, 4  ;;  %s2306_s16 = int_to_ptr.vmem [resolvable:$false] %s2305_s16 }
 0x17a   : > { %1671 = vmatprep.subr.bf16.mxu0 %v2418_v0  ;;  %1691 = vmatprep.subr.bf16.mxu1 %v2418_v0  ;;  %v753_v23 = vsel %vm2921_vm3, %v729_v20, %v747_v16  ;;  %v1977_v13 = vld [vmem:[#allocation14 + $0x38] sm:$0xff]   ;;  %v1983_v20 = vld [vmem:[#allocation17 + $0x28] sm:$0xff]   ;;  %s2307_s22 = scalar_lea.vmem %s2306_s16, 256  ;;  %p2308_p0 = scmp.lt.s32.totalorder %s2995_s15, %s2306_s16 }
 0x17b   : > { %v1980_v16 = vld [vmem:[#allocation17 + $0x10] sm:$0xff]   ;;  %v1981_v17 = vld [vmem:[#allocation17 + $0x18] sm:$0xff]   ;;  %s3137_s12 = smov %s3136_s20  ;;  %s2993_s29 = scalar_lea.hbm %s3136_s20, %s1605_s28 }
 0x17c   : > { %p2304_p5 = pneg %p2303_p1  ;;  %p2309_p6 = scmp.lt.s32.totalorder %s2307_s22, %s2301_s13 }
 0x17d   : > { %1672 = vmatpush3.bf16.msra.mxu0 %v1948_v9  ;;  %1692 = vmatpush3.bf16.msra.mxu1 %v1948_v9  ;;  %v1973_v9 = vld [vmem:[#allocation14 + $0x18] sm:$0xff]  }
 0x17e   : > { %1673 = vmatprep.subr.bf16.mxu0 %v2418_v0  ;;  %1693 = vmatprep.subr.bf16.mxu1 %v2418_v0  ;;  %p2310_p7 = por %p2309_p6, %p2308_p0 }
 0x180   : > { %p2311_p3 = pnand %p2310_p7, %p2304_p5 }
 0x181   : > { %1674 = vmatpush3.bf16.msra.mxu0 %v1949_v12  ;;  %1694 = vmatpush3.bf16.msra.mxu1 %v1949_v12  ;;  %v1976_v12 = vld [vmem:[#allocation14 + $0x30] sm:$0xff]  }
 0x182   : > { %1675 = vmatprep.subr.bf16.mxu0 %v2418_v0  ;;  %1695 = vmatprep.subr.bf16.mxu1 %v2418_v0 }
 0x185   : > { %1676 = vmatpush3.bf16.msra.mxu0 %v1950_v14  ;;  %1696 = vmatpush3.bf16.msra.mxu1 %v1950_v14  ;;  %v1978_v14 = vld [vmem:[#allocation17] sm:$0xff]  }
 0x186   : > { %1677 = vmatprep.subr.bf16.mxu0 %v2418_v0  ;;  %1697 = vmatprep.subr.bf16.mxu1 %v2418_v0 }
 0x189   : > { %1678 = vmatpush3.bf16.msra.mxu0 %v1951_v15  ;;  %1698 = vmatpush3.bf16.msra.mxu1 %v1951_v15  ;;  %v1979_v15 = vld [vmem:[#allocation17 + $0x8] sm:$0xff]  }
 0x18a   : > { %1679 = vmatprep.subr.bf16.mxu0 %v2418_v0  ;;  %1699 = vmatprep.subr.bf16.mxu1 %v2418_v0 }
 0x18d   : > { %1680 = vmatpush3.bf16.msra.mxu0 %v1952_v18  ;;  %1700 = vmatpush3.bf16.msra.mxu1 %v1952_v18  ;;  %v1982_v18 = vld [vmem:[#allocation17 + $0x20] sm:$0xff]  }
 0x18e   : > { %1705 = vmatprep.subr.bf16.mxu0 %v2418_v0  ;;  %1725 = vmatprep.subr.bf16.mxu1 %v2418_v0 }
 0x190   : > { %1682 = vmatmul.mubr.bf16.vlgmr.msra.gmra.mrb[0].mxu0 %v2928_v19  ;;  %1702 = vmatmul.mubr.bf16.vlgmr.msra.gmra.mrb[0].mxu1 %v753_v23 }
 0x191   : > { %1706 = vmatpush3.bf16.msra.mxu0 %v1954_v21  ;;  %1726 = vmatpush3.bf16.msra.mxu1 %v1956_v22  ;;  %v1984_v21 = vld [vmem:[#allocation17 + $0x30] sm:$0xff]   ;;  %v1985_v22 = vld [vmem:[#allocation17 + $0x38] sm:$0xff]  }
 0x192   : > { %1707 = vmatprep.subr.bf16.mxu0 %v2418_v0  ;;  %1727 = vmatprep.subr.bf16.mxu1 %v2418_v0 }
 0x193   : > { %1721 = vmatprep.mubr.msk.bf16.mxu0 %vm2419_vm0, %v2418_v0  ;;  %1741 = vmatprep.mubr.msk.bf16.mxu1 %vm2419_vm0, %v2418_v0 }
 0x195   : > { %1708 = vmatpush3.bf16.msra.mxu0 %v1955_v24  ;;  %1728 = vmatpush3.bf16.msra.mxu1 %v1958_v25 }
 0x196   : > { %1709 = vmatprep.subr.bf16.mxu0 %v2418_v0  ;;  %1729 = vmatprep.subr.bf16.mxu1 %v2418_v0 }
 0x199   : > { %1710 = vmatpush3.bf16.msra.mxu0 %v1957_v26  ;;  %1730 = vmatpush3.bf16.msra.mxu1 %v1960_v27 }
 0x19a   : > { %1711 = vmatprep.subr.bf16.mxu0 %v2418_v0  ;;  %1731 = vmatprep.subr.bf16.mxu1 %v2418_v0 }
 0x19d   : > { %1712 = vmatpush3.bf16.msra.mxu0 %v1959_v28  ;;  %1732 = vmatpush3.bf16.msra.mxu1 %v1962_v29 }
 0x19e   : > { %1713 = vmatprep.subr.bf16.mxu0 %v2418_v0  ;;  %1733 = vmatprep.subr.bf16.mxu1 %v2418_v0 }
 0x1a1   : > { %1714 = vmatpush3.bf16.msra.mxu0 %v1961_v30  ;;  %1734 = vmatpush3.bf16.msra.mxu1 %v1964_v31 }
 0x1a2   : > { %1715 = vmatprep.subr.bf16.mxu0 %v2418_v0  ;;  %1735 = vmatprep.subr.bf16.mxu1 %v2418_v0 }
 0x1a5   : > { %1716 = vmatpush3.bf16.msra.mxu0 %v1963_v32  ;;  %1736 = vmatpush3.bf16.msra.mxu1 %v1966_v34  ;;  %v1585_v34 = vld [vmem:[#allocation16] ss:$0 sm:$0xff] }
 0x1a6   : > { %1717 = vmatprep.subr.bf16.mxu0 %v2418_v0  ;;  %1737 = vmatprep.subr.bf16.mxu1 %v2418_v0 }
 0x1a9   : > { %1718 = vmatpush3.bf16.msra.mxu0 %v1965_v33  ;;  %1738 = vmatpush3.bf16.msra.mxu1 %v1968_v36 }
 0x1aa   : > { %1719 = vmatprep.subr.bf16.mxu0 %v2418_v0  ;;  %1739 = vmatprep.subr.bf16.mxu1 %v2418_v0 }
 0x1ad   : > { %1720 = vmatpush3.bf16.msra.mxu0 %v1967_v35  ;;  %1740 = vmatpush3.bf16.msra.mxu1 %v1970_v37 }
 0x1ae   : > { %1745 = vmatprep.subr.bf16.mxu0 %v2418_v0  ;;  %1765 = vmatprep.subr.bf16.mxu1 %v2418_v0 }
 0x263   : > { %v720_v39 = vpop.f32.mrb[0].mxu0  ;;  %v788_v40 = vpop.f32.mrb[0].mxu1 }
 0x264   : > { %v721_v41 = vadd.f32 %v1550_v38, %v720_v39  ;;  %v1683_v42 = vpop.f32.mrb[1].mxu0  ;;  %v1703_v44 = vpop.f32.mrb[1].mxu1 }
 0x265   : > { %v723_v45 = vpop.f32.mrb[2].mxu0  ;;  %v791_v48 = vpop.f32.mrb[2].mxu1  ;;  %v1586_v44 = vld [vmem:[#allocation19] ss:$0 sm:$0xff] }
 0x266   : > { %v727_v49 = vmax.f32 %v721_v41, 0.0  ;;  %v724_v50 = vadd.f32 %v1550_v38, %v723_v45  ;;  %v1684_v51 = vpop.f32.mrb[3].mxu0  ;;  %v1704_v52 = vpop.f32.mrb[3].mxu1  ;;  %v1288_v45 = vunpack.c.l.bf16 %v2928_v19 }
 0x268   : > { %v728_v53 = vmax.f32 %v724_v50, 0.0  ;;  %v812_v55 = vrot.slane %v727_v49, 7  ;;  %v830_v58 = vrot.slane %v727_v49, 1 }
 0x26a   : > { %v813_v59 = vrot.slane %v728_v53, 7  ;;  %v831_v60 = vrot.slane %v728_v53, 1  ;;  %v846_v61 = vpack.c.bf16 %v728_v53, %v727_v49  ;;  %v1289_v49 = vunpack.c.h.bf16 %v2928_v19 }
 0x26c   : > { %v816_v62 = vsel %vm814_vm4, %v813_v59, %v812_v55  ;;  %v834_v63 = vsel %vm832_vm5, %v831_v60, %v830_v58  ;;  %1722 = vmatmul.mubr.bf16.vlgmr.msra.gmra.mrb[4].mxu0 %v846_v61  ;;  %v815_v1 = vsel %vm814_vm4, %v812_v55, %v813_v59  ;;  %v833_v2 = vsel %vm832_vm5, %v830_v58, %v831_v60 }
 0x26d   : > { %1746 = vmatpush3.bf16.msra.mxu0 %v1969_v56  ;;  %v825_v3 = vsel %vm810_vm6, %v824_v54, %v816_v62  ;;  %1761 = vmatprep.mubr.msk.bf16.mxu0 %vm2419_vm0, %v2418_v0  ;;  %v844_v5 = vsel %vm829_vm7, %v842_v57, %v834_v63 }
 0x26e   : > { %1747 = vmatprep.subr.bf16.mxu0 %v2418_v0  ;;  %v827_v6 = vpack.c.bf16 %v815_v1, %v825_v3  ;;  %v845_v7 = vpack.c.bf16 %v844_v5, %v833_v2 }
 0x270   : > { %1742 = vmatmul.mubr.bf16.vlgmr.msra.gmra.mrb[4].mxu1 %v827_v6 }
 0x271   : > { %1748 = vmatpush3.bf16.msra.mxu0 %v1971_v4  ;;  %1781 = vmatprep.mubr.msk.bf16.mxu1 %vm2419_vm0, %v2418_v0 }
 0x272   : > { %1749 = vmatprep.subr.bf16.mxu0 %v2418_v0  ;;  %1766 = vmatpush3.bf16.msra.mxu1 %v1978_v14 }
 0x273   : > { %1767 = vmatprep.subr.bf16.mxu1 %v2418_v0 }
 0x275   : > { %1750 = vmatpush3.bf16.msra.mxu0 %v1972_v8 }
 0x276   : > { %1751 = vmatprep.subr.bf16.mxu0 %v2418_v0  ;;  %1768 = vmatpush3.bf16.msra.mxu1 %v1979_v15 }
 0x277   : > { %1769 = vmatprep.subr.bf16.mxu1 %v2418_v0 }
 0x279   : > { %1752 = vmatpush3.bf16.msra.mxu0 %v1973_v9 }
 0x27a   : > { %1753 = vmatprep.subr.bf16.mxu0 %v2418_v0  ;;  %1770 = vmatpush3.bf16.msra.mxu1 %v1980_v16 }
 0x27b   : > { %1771 = vmatprep.subr.bf16.mxu1 %v2418_v0 }
 0x27d   : > { %1754 = vmatpush3.bf16.msra.mxu0 %v1974_v10 }
 0x27e   : > { %1755 = vmatprep.subr.bf16.mxu0 %v2418_v0  ;;  %1772 = vmatpush3.bf16.msra.mxu1 %v1981_v17 }
 0x27f   : > { %1773 = vmatprep.subr.bf16.mxu1 %v2418_v0 }
 0x281   : > { %1756 = vmatpush3.bf16.msra.mxu0 %v1975_v11 }
 0x282   : > { %1757 = vmatprep.subr.bf16.mxu0 %v2418_v0  ;;  %1774 = vmatpush3.bf16.msra.mxu1 %v1982_v18 }
 0x283   : > { %1775 = vmatprep.subr.bf16.mxu1 %v2418_v0 }
 0x285   : > { %1758 = vmatpush3.bf16.msra.mxu0 %v1976_v12 }
 0x286   : > { %1759 = vmatprep.subr.bf16.mxu0 %v2418_v0  ;;  %1776 = vmatpush3.bf16.msra.mxu1 %v1983_v20 }
 0x287   : > { %1777 = vmatprep.subr.bf16.mxu1 %v2418_v0 }
 0x289   : > { %1760 = vmatpush3.bf16.msra.mxu0 %v1977_v13 }
 0x28a   : > { %1778 = vmatpush3.bf16.msra.mxu1 %v1984_v21 }
 0x28b   : > { %1779 = vmatprep.subr.bf16.mxu1 %v2418_v0 }
 0x28c   : > { %1762 = vmatmul.mubr.bf16.vlgmr.msra.gmra.mrb[8].mxu0 %v845_v7 }
 0x28e   : > { %1780 = vmatpush3.bf16.msra.mxu1 %v1985_v22 }
 0x33f   : > { %v961_v23 = vpop.f32.mrb[4].mxu0 }
 0x340   : > { %v1723_v24 = vpop.f32.mrb[5].mxu0 }
 0x341   : > { %v964_v25 = vpop.f32.mrb[6].mxu0 }
 0x342   : > { %v1724_v26 = vpop.f32.mrb[7].mxu0 }
 0x343   : > { %v1050_v27 = vpop.f32.mrb[4].mxu1 }
 0x344   : > { %v1051_v28 = vadd.f32 %v1050_v27, %v961_v23  ;;  %v1743_v29 = vpop.f32.mrb[5].mxu1 }
 0x345   : > { %v1053_v30 = vpop.f32.mrb[6].mxu1 }
 0x346   : > { %v1054_v31 = vadd.f32 %v1053_v30, %v964_v25  ;;  %v1744_v32 = vpop.f32.mrb[7].mxu1 }
 0x35f   : > { %v1155_v33 = vpop.f32.mrb[8].mxu0 }
 0x360   : > { %v1162_v35 = vadd.f32 %v1155_v33, %v1051_v28  ;;  %v1763_v36 = vpop.f32.mrb[9].mxu0 }
 0x361   : > { %v1158_v37 = vpop.f32.mrb[10].mxu0 }
 0x362   : > { %v1171_v38 = vadd.f32 %v1585_v34, %v1162_v35  ;;  %v1163_v39 = vadd.f32 %v1158_v37, %v1054_v31  ;;  %v1764_v0 = vpop.f32.mrb[11].mxu0 }
 0x364   : > { %v1172_v40 = vadd.f32 %v1585_v34, %v1163_v39  ;;  %v1173_v41 = vmax.f32 %v1171_v38, 0.0 }
 0x366   : > { %v1174_v42 = vmax.f32 %v1172_v40, 0.0 }
 0x368   : > { %v1175_v43 = vpack.c.bf16 %v1174_v42, %v1173_v41 }
 0x36a   : > { %1782 = vmatmul.mubr.bf16.vlgmr.msra.gmra.mrb[8].mxu1 %v1175_v43 }
 0x43d   : > { %v1281_v46 = vpop.f32.mrb[8].mxu1 }
 0x43e   : > { %v1282_v47 = vadd.f32 %v1586_v44, %v1281_v46  ;;  %v1783_v48 = vpop.f32.mrb[9].mxu1 }
 0x43f   : > { %v1284_v50 = vpop.f32.mrb[10].mxu1 }
 0x440   : > { %v1290_v51 = vadd.f32 %v1288_v45, %v1282_v47  ;;  %v1285_v52 = vadd.f32 %v1586_v44, %v1284_v50  ;;  %v1784_v53 = vpop.f32.mrb[11].mxu1 }
 0x442   : > { %v1291_v54 = vadd.f32 %v1289_v49, %v1285_v52  ;;  %v1292_v55 = vmax.f32 %v1290_v51, 0.0 }
 0x444   : > { %v1293_v56 = vmax.f32 %v1291_v54, 0.0 }
 0x446   : > { %v1609_v19 = vpack.c.bf16 %v1293_v56, %v1292_v55 }
 0x448   : > { %1610 = vst [vmem:[%s603_s4] sm:$0xff] %v1609_v19  }
 0x449   : > { %2314 = shalt.err (!%p2311_p3)
}
 0x44a   : > { %s2315_s11 = scalar_lea.hbm %s2993_s29, 128  ;;  %s2319_s9 = scalar_lea.hbm %s3137_s12, 256 }
 0x44b   : > { %p2316_p13 = scmp.ne.s32.totalorder %s2993_s29, %s2315_s11  ;;  %p2320_p8 = scmp.lt.u32.totalorder %s2993_s29, %s3137_s12 }
 0x44c   : > { %p2321_p12 = scmp.lt.u32.totalorder %s2319_s9, %s2315_s11  ;;  %p2323_p10 = scmp.lt.u32.totalorder %s2315_s11, %s2993_s29 }
 0x44d   : > { %p2317_p2 = pnand %p2316_p13, %p3138_p11 }
 0x44e   : > { %p2322_p9 = por %p2321_p12, %p2320_p8 }
 0x44f   : > { %p2318_p4 = pneg %p2317_p2 }
 0x450   : > { %p2324_p1 = por %p2323_p10, %p2322_p9 }
 0x452   : > { %p2325_p5 = pnand %p2324_p1, %p2318_p4 }
 0x454   : > { %2328 = shalt.err (!%p2325_p5)
}
 0x455   : > { %s2422_s24 = smov 64   ;;  %s2423_s23 = smov 4  }
 0x456   : > { %1823 = dma.vmem_to_hbm [thread:$0]  (%p3138_p11), %s2995_s15, 128, %s2993_s29, %s1305_s5, %s2422_s24, %s2422_s24, %s2423_s23  }
 0x457 PF: > { %s3139_s28 = sld [smem:[#allocation34_spill]]  ;;  %s3140_s4 = sld [smem:[#allocation30_spill]] }
 0x458   : > { %s1335_s19 = sand.u32 1, %s2383_s17  }
 0x459   : > { %s1336_s26 = scalar_lea.sflag [#allocation4], %s1335_s19 }
 0x45d   : > { %p3141_p0 = scmp.ne.s32.totalorder %s3139_s28, 0  ;;  %p3142_p6 = scmp.ge.s32.totalorder %s3140_s4, 2 }
 0x45f   : > { %p1861_p7 = pnand %p3142_p6, %p3141_p0 }
 0x461   : > { %2378 = dma.done.wait (!%p1861_p7), %s1336_s26, 128  }
 0x462   : > { %2380 = vsyncadd (!%p1861_p7), %s1336_s26, 4294967168  ;;  %s34_s22 = sadd.s32 1, %s3140_s4   ;;  %s3143_s20 = sld [smem:[#allocation28_spill]] }
 0x463   : > { %p31_p3 = scmp.ge.s32.totalorder %s34_s22, 4   ;;  %s3144_s19 = sld [smem:[#allocation33_spill]] }
 0x464   : > { %s3145_s30 = sld [smem:[#allocation32_spill]]  ;;  %s3146_s17 = smov %s2387_s18 }
 0x465   :  { %33 = sbr.rel (!%p31_p3) target bundleno = 22 (0x16), region = 165 }
 0x468   : > { %s3147_s18 = smov %s3143_s20  ;;  %s3148_s20 = smov %s2399_s21 }
 0x46a   : > { %s3149_s21 = smov %s3145_s30 }
 0x46c   :  { %1341 = vsyncpa [#allocation3], 1 }
 0x46d   :  { %1343 = vsyncpa [#allocation3 + $0x1], 1 }
 0x46e   :  { %1344 = vsyncpa [#allocation6], 1 }
 0x46f   :  { %1346 = vsyncpa [#allocation6 + $0x1], 1 }
 0x470   :  { %1347 = vsyncpa [#allocation9], 1 }
 0x471   :  { %1348 = vsyncpa [#allocation12], 1 }
 0x472   :  { %1349 = vsyncpa [#allocation15], 1 }
 0x473   :  { %1350 = vsyncpa [#allocation18], 1 }
 0x474   :  { %1351 = vsyncpa [#allocation4], 1 }
 0x475   :  { %1353 = vsyncpa [#allocation4 + $0x1], 1 }

</bundles_post_ra>
